<compile_context>
chip_gen: v6e
topology: v6e:2x2x1
jax: 0.10.0
libtpu: 0.0.40
codegen_flags: <defaults>
</compile_context>

<pallas_src>
import functools
import math

import jax
import jax.numpy as jnp
from jax import lax
from jax.experimental import pallas as pl
from jax.experimental.pallas import tpu as pltpu

SEED = 14


def _convpool_kernel(x_ref, w_ref, b_ref, o_ref, xcol_ref, *,
                     NB, Hc, Ho, Wo, Cout, KH, KW, SEG, NL, OUT_L):
    # x_ref:    (NB, Hp, SEG)        pre-padded input rows, channels minor, lane-padded
    # w_ref:    (KH*SEG, NL)         Toeplitz-expanded conv weight (zero rows in lane pad)
    # b_ref:    (1, NL)              bias tiled along W
    # o_ref:    (NB, Ho, OUT_L)      pooled output, lane-dense (OUT_L multiple of 128)
    # xcol_ref: (NB*Hc, KH*SEG)      im2row scratch; every element is written below,
    #                                so no zero-init is needed (padding done in wrapper).

    # im2row: copy the KH row-shifted views of each padded image into the
    # lane-aligned segments of the scratch.  Destination rows start at multiples
    # of Hc (mult. of 8) and lanes at multiples of SEG (128) -> dense stores.
    for b in range(NB):
        for kh in range(KH):
            xcol_ref[b * Hc:(b + 1) * Hc, kh * SEG:(kh + 1) * SEG] = \
                x_ref[b, kh:kh + Hc, :]

    # One MXU matmul: (NB*Hc, KH*SEG) @ (KH*SEG, NL) -> (NB*Hc, NL).
    y = lax.dot_general(xcol_ref[...], w_ref[...],
                        dimension_numbers=(((1,), (0,)), ((), ())),
                        preferred_element_type=jnp.float32)

    # Bias + Tanh (EUP).
    y = jnp.tanh(y + b_ref[...])                           # (NB*Hc, NL)

    # Separable MaxPool2d(KHxKW, stride=1, pad=0): lane (kw) direction first.
    r = y[:, 0:Wo * Cout]
    for kw in range(1, KW):
        r = jnp.maximum(r, y[:, kw * Cout:kw * Cout + Wo * Cout])   # (NB*Hc, Wo*Cout)

    # Pad to a lane-dense, 128-multiple-wide slab (tail lanes sliced off in wrapper).
    if OUT_L > Wo * Cout:
        tail = jnp.zeros((NB * Hc, OUT_L - Wo * Cout), jnp.float32)
        r = jnp.concatenate([r, tail], axis=-1)            # (NB*Hc, OUT_L)

    # Sublane (kh) direction, per image so the pool never crosses image edges.
    for b in range(NB):
        rb = r[b * Hc:(b + 1) * Hc, :]                     # (Hc, OUT_L)
        mb = rb[0:Ho, :]
        for kh in range(1, KH):
            mb = jnp.maximum(mb, rb[kh:kh + Ho, :])        # (Ho, OUT_L)
        o_ref[b] = mb.astype(o_ref.dtype)                  # full-width dense store

    # Dropout (inference): identity.


@functools.partial(jax.jit, static_argnames=("kernel_size", "padding", "nb"))
def conv_pool2d(x_nchw, w_oihw, bias, *, kernel_size=3, padding=1, nb=None):
    """x_nchw: (N, Cin, H, W) float32. Returns (N, Cout, Ho, Wo) float32.

    Matches nn.Conv2d(k, stride=1, padding=1) -> Tanh -> MaxPool2d(k, stride=1)
    (the PyTorch module hardcodes padding=1 regardless of kernel_size).
    """
    N, Cin, H, W = x_nchw.shape
    Cout = w_oihw.shape[0]
    KH = KW = kernel_size
    pad = padding
    Hp, Wp = H + 2 * pad, W + 2 * pad
    Hc, Wc = Hp - KH + 1, Wp - KW + 1            # conv output spatial
    Ho, Wo = Hc - KH + 1, Wc - KW + 1            # maxpool output spatial
    SEG = ((Wp * Cin + 127) // 128) * 128        # lane-aligned im2row segment width
    K = KH * SEG                                 # matmul contraction depth (mult of 128)
    NL = Wc * Cout                               # lane-dense activation width
    OUT_L = ((Wo * Cout + 127) // 128) * 128     # lane-dense output width

    # Batch NB images per grid step (targets NB*Hc ~ 128 MXU rows).
    NB = nb if nb is not None else min(N, 8)
    num_blocks = pl.cdiv(N, NB)
    N_pad = num_blocks * NB

    # Input: NCHW -> NHWC, pad batch/spatial, flatten W*Cin, lane-pad to SEG.
    x_hwc = jnp.transpose(x_nchw, (0, 2, 3, 1)).astype(jnp.float32)       # (N, H, W, Cin)
    x_hwc = jnp.pad(x_hwc, ((0, N_pad - N), (pad, pad), (pad, pad), (0, 0)))
    x_rows = x_hwc.reshape(N_pad, Hp, Wp * Cin)
    x_rows = jnp.pad(x_rows, ((0, 0), (0, 0), (0, SEG - Wp * Cin)))       # (N_pad, Hp, SEG)

    # Toeplitz-expanded weight: Wbig[kh*SEG + wp*Cin + c, w*Cout + o]
    #   = w[o, c, kh, wp - w]  if 0 <= wp - w < KW else 0.  Lane-pad rows are zero.
    w_k = jnp.transpose(w_oihw, (2, 3, 1, 0)).astype(jnp.float32)         # (KH, KW, Cin, Cout)
    wp_idx = jnp.arange(Wp)[:, None]                                      # (Wp, 1)
    w_idx = jnp.arange(Wc)[None, :]                                       # (1, Wc)
    kw_off = wp_idx - w_idx                                               # (Wp, Wc)
    valid = ((kw_off >= 0) & (kw_off < KW)).astype(jnp.float32)
    kw_clamped = jnp.clip(kw_off, 0, KW - 1)
    big = w_k[:, kw_clamped]                                              # (KH, Wp, Wc, Cin, Cout)
    big = big * valid[None, :, :, None, None]
    w_seg = jnp.transpose(big, (0, 1, 3, 2, 4)).reshape(KH, Wp * Cin, NL)
    w_seg = jnp.pad(w_seg, ((0, 0), (0, SEG - Wp * Cin), (0, 0)))
    w_big = w_seg.reshape(K, NL)                                          # (K, Wc*Cout)

    b_tile = jnp.tile(bias.astype(jnp.float32), Wc).reshape(1, NL)        # (1, Wc*Cout)

    kernel = functools.partial(
        _convpool_kernel, NB=NB, Hc=Hc, Ho=Ho, Wo=Wo, Cout=Cout,
        KH=KH, KW=KW, SEG=SEG, NL=NL, OUT_L=OUT_L)

    out_slab = pl.pallas_call(
        kernel,
        out_shape=jax.ShapeDtypeStruct((N_pad, Ho, OUT_L), jnp.float32),
        grid=(num_blocks,),
        in_specs=[
            pl.BlockSpec((NB, Hp, SEG), lambda n: (n, 0, 0)),
            pl.BlockSpec((K, NL), lambda n: (0, 0)),      # weight: VMEM-resident
            pl.BlockSpec((1, NL), lambda n: (0, 0)),      # bias:   VMEM-resident
        ],
        out_specs=pl.BlockSpec((NB, Ho, OUT_L), lambda n: (n, 0, 0)),
        scratch_shapes=[pltpu.VMEM((NB * Hc, K), jnp.float32)],
        compiler_params=pltpu.CompilerParams(
            dimension_semantics=("parallel",)),
    )(x_rows, w_big, b_tile)

    out = out_slab[:N, :, :Wo * Cout].reshape(N, Ho, Wo, Cout)
    return jnp.transpose(out, (0, 3, 1, 2))               # back to NCHW


def init_params(in_channels, out_channels, kernel_size, key):
    """Deterministic init mimicking nn.Conv2d default (uniform, 1/sqrt(fan_in) bounds)."""
    kw_key, kb_key = jax.random.split(key)
    fan_in = in_channels * kernel_size * kernel_size
    bound = 1.0 / math.sqrt(fan_in)
    w = jax.random.uniform(kw_key,
                           (out_channels, in_channels, kernel_size, kernel_size),
                           minval=-bound, maxval=bound, dtype=jnp.float32)
    b = jax.random.uniform(kb_key, (out_channels,),
                           minval=-bound, maxval=bound, dtype=jnp.float32)
    return w, b


def _reference(x_nchw, w_oihw, bias, kernel_size=3):
    conv = lax.conv_general_dilated(
        x_nchw, w_oihw, window_strides=(1, 1),
        padding=((1, 1), (1, 1)),
        dimension_numbers=("NCHW", "OIHW", "NCHW"))
    conv = conv + bias.reshape(1, -1, 1, 1)
    act = jnp.tanh(conv)
    pooled = lax.reduce_window(
        act, -jnp.inf, lax.max,
        window_dimensions=(1, 1, kernel_size, kernel_size),
        window_strides=(1, 1, 1, 1),
        padding="VALID")
    return pooled


if __name__ == "__main__":
    in_channels, out_channels, kernel_size, p = 4, 8, 3, 0.5
    N, H, W = 2, 16, 16

    key = jax.random.PRNGKey(0)
    xk, _ = jax.random.split(key)
    x = jax.random.normal(xk, (N, in_channels, H, W), dtype=jnp.float32)
    w, b = init_params(in_channels, out_channels, kernel_size, jax.random.PRNGKey(SEED))

    out = conv_pool2d(x, w, b, kernel_size=kernel_size, padding=1)
    out = jax.block_until_ready(out)

    ref = _reference(x, w, b, kernel_size)
    assert out.shape == ref.shape, (out.shape, ref.shape)
    assert jnp.allclose(out, ref, atol=1e-5, rtol=1e-5), float(jnp.max(jnp.abs(out - ref)))

    print("KERNEL_OK")
</pallas_src>

<mosaic_0001>
module attributes {stable_mosaic.version = 11 : i64} {
  func.func @_convpool_kernel(%arg0: i32, %arg1: memref<2x18x128xf32, #tpu.memory_space<vmem>>, %arg2: memref<384x128xf32, #tpu.memory_space<vmem>>, %arg3: memref<1x128xf32, #tpu.memory_space<vmem>>, %arg4: memref<2x14x128xf32, #tpu.memory_space<vmem>>, %arg5: memref<32x384xf32, #tpu.memory_space<vmem>>) attributes {dimension_semantics = [#tpu.dimension_semantics<parallel>], iteration_bounds = array<i64: 1>, scalar_prefetch = 0 : i64, scratch_operands = 1 : i64, tpu.core_type = #tpu.core_type<tc>, window_params = [{transform_indices = @transform_0, window_bounds = array<i64: 2, 18, 128>}, {pipeline_mode = #tpu.pipeline_mode<synchronous>, transform_indices = @transform_1, window_bounds = array<i64: 384, 128>}, {pipeline_mode = #tpu.pipeline_mode<synchronous>, transform_indices = @transform_2, window_bounds = array<i64: 1, 128>}, {transform_indices = @transform_3, window_bounds = array<i64: 2, 14, 128>}]} {
    %c0 = arith.constant 0 : index
    %c0_0 = arith.constant 0 : index
    %c0_1 = arith.constant 0 : index
    %0 = vector.load %arg1[%c0, %c0_0, %c0_1] : memref<2x18x128xf32, #tpu.memory_space<vmem>>, vector<1x16x128xf32>
    %1 = vector.shape_cast %0 : vector<1x16x128xf32> to vector<16x128xf32>
    %c0_2 = arith.constant 0 : index
    %c0_3 = arith.constant 0 : index
    %2 = vector.load %arg5[%c0_2, %c0_3] : memref<32x384xf32, #tpu.memory_space<vmem>>, vector<16x128xf32>
    tpu.vector_store %arg5[%c0_2, %c0_3], %1 {strides = array<i32>} : memref<32x384xf32, #tpu.memory_space<vmem>>, vector<16x128xf32>,
    %c0_4 = arith.constant 0 : index
    %c1 = arith.constant 1 : index
    %c0_5 = arith.constant 0 : index
    %3 = vector.load %arg1[%c0_4, %c1, %c0_5] : memref<2x18x128xf32, #tpu.memory_space<vmem>>, vector<1x16x128xf32>
    %4 = vector.shape_cast %3 : vector<1x16x128xf32> to vector<16x128xf32>
    %c0_6 = arith.constant 0 : index
    %c128 = arith.constant 128 : index
    %5 = vector.load %arg5[%c0_6, %c128] : memref<32x384xf32, #tpu.memory_space<vmem>>, vector<16x128xf32>
    tpu.vector_store %arg5[%c0_6, %c128], %4 {strides = array<i32>} : memref<32x384xf32, #tpu.memory_space<vmem>>, vector<16x128xf32>,
    %c0_7 = arith.constant 0 : index
    %c2 = arith.constant 2 : index
    %c0_8 = arith.constant 0 : index
    %6 = vector.load %arg1[%c0_7, %c2, %c0_8] : memref<2x18x128xf32, #tpu.memory_space<vmem>>, vector<1x16x128xf32>
    %7 = vector.shape_cast %6 : vector<1x16x128xf32> to vector<16x128xf32>
    %c0_9 = arith.constant 0 : index
    %c256 = arith.constant 256 : index
    %8 = vector.load %arg5[%c0_9, %c256] : memref<32x384xf32, #tpu.memory_space<vmem>>, vector<16x128xf32>
    tpu.vector_store %arg5[%c0_9, %c256], %7 {strides = array<i32>} : memref<32x384xf32, #tpu.memory_space<vmem>>, vector<16x128xf32>,
    %c1_10 = arith.constant 1 : index
    %c0_11 = arith.constant 0 : index
    %c0_12 = arith.constant 0 : index
    %9 = vector.load %arg1[%c1_10, %c0_11, %c0_12] : memref<2x18x128xf32, #tpu.memory_space<vmem>>, vector<1x16x128xf32>
    %10 = vector.shape_cast %9 : vector<1x16x128xf32> to vector<16x128xf32>
    %c16 = arith.constant 16 : index
    %c0_13 = arith.constant 0 : index
    %11 = vector.load %arg5[%c16, %c0_13] : memref<32x384xf32, #tpu.memory_space<vmem>>, vector<16x128xf32>
    tpu.vector_store %arg5[%c16, %c0_13], %10 {strides = array<i32>} : memref<32x384xf32, #tpu.memory_space<vmem>>, vector<16x128xf32>,
    %c1_14 = arith.constant 1 : index
    %c1_15 = arith.constant 1 : index
    %c0_16 = arith.constant 0 : index
    %12 = vector.load %arg1[%c1_14, %c1_15, %c0_16] : memref<2x18x128xf32, #tpu.memory_space<vmem>>, vector<1x16x128xf32>
    %13 = vector.shape_cast %12 : vector<1x16x128xf32> to vector<16x128xf32>
    %c16_17 = arith.constant 16 : index
    %c128_18 = arith.constant 128 : index
    %14 = vector.load %arg5[%c16_17, %c128_18] : memref<32x384xf32, #tpu.memory_space<vmem>>, vector<16x128xf32>
    tpu.vector_store %arg5[%c16_17, %c128_18], %13 {strides = array<i32>} : memref<32x384xf32, #tpu.memory_space<vmem>>, vector<16x128xf32>,
    %c1_19 = arith.constant 1 : index
    %c2_20 = arith.constant 2 : index
    %c0_21 = arith.constant 0 : index
    %15 = vector.load %arg1[%c1_19, %c2_20, %c0_21] : memref<2x18x128xf32, #tpu.memory_space<vmem>>, vector<1x16x128xf32>
    %16 = vector.shape_cast %15 : vector<1x16x128xf32> to vector<16x128xf32>
    %c16_22 = arith.constant 16 : index
    %c256_23 = arith.constant 256 : index
    %17 = vector.load %arg5[%c16_22, %c256_23] : memref<32x384xf32, #tpu.memory_space<vmem>>, vector<16x128xf32>
    tpu.vector_store %arg5[%c16_22, %c256_23], %16 {strides = array<i32>} : memref<32x384xf32, #tpu.memory_space<vmem>>, vector<16x128xf32>,
    %c0_24 = arith.constant 0 : index
    %c0_25 = arith.constant 0 : index
    %18 = vector.load %arg5[%c0_24, %c0_25] : memref<32x384xf32, #tpu.memory_space<vmem>>, vector<32x384xf32>
    %c0_26 = arith.constant 0 : index
    %c0_27 = arith.constant 0 : index
    %19 = vector.load %arg2[%c0_26, %c0_27] : memref<384x128xf32, #tpu.memory_space<vmem>>, vector<384x128xf32>
    %cst = arith.constant dense<0.000000e+00> : vector<32x128xf32>
    %20 = tpu.matmul %18, %19, %cst {dimension_numbers = #tpu.dot_dimension_numbers<[1], [0], [0], [1], [0, 0, 1, 1], [], []>} : vector<32x384xf32>, vector<384x128xf32>, vector<32x128xf32> -> vector<32x128xf32>
    %c0_28 = arith.constant 0 : index
    %c0_29 = arith.constant 0 : index
    %21 = vector.load %arg3[%c0_28, %c0_29] : memref<1x128xf32, #tpu.memory_space<vmem>>, vector<1x128xf32>
    %22 = vector.broadcast %21 : vector<1x128xf32> to vector<32x128xf32>
    %23 = arith.addf %20, %22 : vector<32x128xf32>
    %24 = math.tanh %23 : vector<32x128xf32>
    %25 = vector.extract_strided_slice %24 {offsets = [0, 0], sizes = [32, 112], strides = [1, 1]} : vector<32x128xf32> to vector<32x112xf32>
    %26 = vector.extract_strided_slice %24 {offsets = [0, 8], sizes = [32, 112], strides = [1, 1]} : vector<32x128xf32> to vector<32x112xf32>
    %27 = arith.maximumf %25, %26 : vector<32x112xf32>
    %28 = vector.extract_strided_slice %24 {offsets = [0, 16], sizes = [32, 112], strides = [1, 1]} : vector<32x128xf32> to vector<32x112xf32>
    %29 = arith.maximumf %27, %28 : vector<32x112xf32>
    %cst_30 = arith.constant 0.000000e+00 : f32
    %30 = vector.broadcast %cst_30 : f32 to vector<32x16xf32>
    %31 = tpu.concatenate %29, %30 in 1 : vector<32x112xf32>, vector<32x16xf32> -> vector<32x128xf32>
    %32 = vector.extract_strided_slice %31 {offsets = [0, 0], sizes = [16, 128], strides = [1, 1]} : vector<32x128xf32> to vector<16x128xf32>
    %33 = vector.extract_strided_slice %32 {offsets = [0, 0], sizes = [14, 128], strides = [1, 1]} : vector<16x128xf32> to vector<14x128xf32>
    %34 = vector.extract_strided_slice %32 {offsets = [1, 0], sizes = [14, 128], strides = [1, 1]} : vector<16x128xf32> to vector<14x128xf32>
    %35 = arith.maximumf %33, %34 : vector<14x128xf32>
    %36 = vector.extract_strided_slice %32 {offsets = [2, 0], sizes = [14, 128], strides = [1, 1]} : vector<16x128xf32> to vector<14x128xf32>
    %37 = arith.maximumf %35, %36 : vector<14x128xf32>
    %c0_31 = arith.constant 0 : index
    %c0_32 = arith.constant 0 : index
    %c0_33 = arith.constant 0 : index
    %38 = vector.load %arg4[%c0_31, %c0_32, %c0_33] : memref<2x14x128xf32, #tpu.memory_space<vmem>>, vector<1x14x128xf32>
    %39 = vector.shape_cast %38 : vector<1x14x128xf32> to vector<14x128xf32>
    %40 = vector.shape_cast %37 : vector<14x128xf32> to vector<1x14x128xf32>
    tpu.vector_store %arg4[%c0_31, %c0_32, %c0_33], %40 {strides = array<i32>} : memref<2x14x128xf32, #tpu.memory_space<vmem>>, vector<1x14x128xf32>,
    %41 = vector.extract_strided_slice %31 {offsets = [16, 0], sizes = [16, 128], strides = [1, 1]} : vector<32x128xf32> to vector<16x128xf32>
    %42 = vector.extract_strided_slice %41 {offsets = [0, 0], sizes = [14, 128], strides = [1, 1]} : vector<16x128xf32> to vector<14x128xf32>
    %43 = vector.extract_strided_slice %41 {offsets = [1, 0], sizes = [14, 128], strides = [1, 1]} : vector<16x128xf32> to vector<14x128xf32>
    %44 = arith.maximumf %42, %43 : vector<14x128xf32>
    %45 = vector.extract_strided_slice %41 {offsets = [2, 0], sizes = [14, 128], strides = [1, 1]} : vector<16x128xf32> to vector<14x128xf32>
    %46 = arith.maximumf %44, %45 : vector<14x128xf32>
    %c1_34 = arith.constant 1 : index
    %c0_35 = arith.constant 0 : index
    %c0_36 = arith.constant 0 : index
    %47 = vector.load %arg4[%c1_34, %c0_35, %c0_36] : memref<2x14x128xf32, #tpu.memory_space<vmem>>, vector<1x14x128xf32>
    %48 = vector.shape_cast %47 : vector<1x14x128xf32> to vector<14x128xf32>
    %49 = vector.shape_cast %46 : vector<14x128xf32> to vector<1x14x128xf32>
    tpu.vector_store %arg4[%c1_34, %c0_35, %c0_36], %49 {strides = array<i32>} : memref<2x14x128xf32, #tpu.memory_space<vmem>>, vector<1x14x128xf32>,
    return
  }
  func.func @transform_0(%arg0: i32) -> (i32, i32, i32) {
    %c0_i32 = arith.constant 0 : i32
    %c0_i32_0 = arith.constant 0 : i32
    %c0_i32_1 = arith.constant 0 : i32
    return %arg0, %c0_i32, %c0_i32_0 : i32, i32, i32
  }
  func.func @transform_1(%arg0: i32) -> (i32, i32) {
    %c0_i32 = arith.constant 0 : i32
    %c0_i32_0 = arith.constant 0 : i32
    %c0_i32_1 = arith.constant 0 : i32
    return %c0_i32, %c0_i32_0 : i32, i32
  }
  func.func @transform_2(%arg0: i32) -> (i32, i32) {
    %c0_i32 = arith.constant 0 : i32
    %c0_i32_0 = arith.constant 0 : i32
    %c0_i32_1 = arith.constant 0 : i32
    return %c0_i32, %c0_i32_0 : i32, i32
  }
  func.func @transform_3(%arg0: i32) -> (i32, i32, i32) {
    %c0_i32 = arith.constant 0 : i32
    %c0_i32_0 = arith.constant 0 : i32
    %c0_i32_1 = arith.constant 0 : i32
    return %arg0, %c0_i32, %c0_i32_0 : i32, i32, i32
  }
}

</mosaic_0001>

<bundles_post_ra>
// kernel: tile.8
= control target key start
LH: loop header
LB: loop body
LE: loop exit
PB: predicated region body
PF: predicated region fallthrough
CT: control target
= control target key end

     0   :  { %s28_s0 = inlined_call_operand.vmem [shape: f32[8], index: 0, kind: input, shape index: {}]   ;;  %s29_s1 = inlined_call_operand.vmem [shape: f32[16,8], index: 1, kind: output, shape index: {}]  }
   0x1   :  { %v4_v0 = vld [vmem:[%s28_s0] ss:$0 sm:$0xff] }
   0x2   :  { %5 = vst [vmem:[%s29_s1] sm:$0xff] %v4_v0  ;;  %8 = vst [vmem:[%s29_s1 + $0x8] sm:$0xff] %v4_v0 }

// kernel: tile.9
= control target key start
LH: loop header
LB: loop body
LE: loop exit
PB: predicated region body
PF: predicated region fallthrough
CT: control target
= control target key end

     0   :  { %s133_s10 = smov 120   ;;  %s134_s11 = smov 104   ;;  %vm3_vm0 = vcmask 64512   ;;  %vm9_vm1 = vcmask 1048512   ;;  %vm15_vm2 = vcmask 982912   ;;  %vm21_vm3 = vcmask 917312   ;;  %s209_s0 = inlined_call_operand.vmem [shape: f32[16,8], index: 0, kind: input, shape index: {}]   ;;  %s210_s1 = inlined_call_operand.vmem [shape: f32[1,128], index: 1, kind: output, shape index: {}]  }
   0x1   :  { %v103_v0 = vld [vmem:[%s209_s0 + $0xf] sm:$0x1]   ;;  %v105_v1 = vld [vmem:[%s209_s0 + $0xd] sm:$0x1]   ;;  %v104_v2 = vld [vmem:[%s209_s0 + $0xe] sm:$0x1]  }
   0x2   :  { %7 = vrot.lane.b32.xlu0 %v103_v0, %s133_s10  ;;  %19 = vrot.lane.b32.xlu1 %v105_v1, %s134_s11  ;;  %v106_v3 = vld [vmem:[%s209_s0 + $0xc] sm:$0x1]   ;;  %s135_s16 = smov 112   ;;  %s136_s17 = smov 96   ;;  %v107_v4 = vld [vmem:[%s209_s0 + $0xb] sm:$0x1]  }
   0x3   :  { %v108_v5 = vld [vmem:[%s209_s0 + $0xa] sm:$0x1]   ;;  %v2_v6 = vld [vmem:[%s209_s0] sm:$0x1]   ;;  %s137_s24 = smov 88   ;;  %s138_s25 = smov 80  }
   0x4   :  { %4 = vst.msk [vmem:[#allocation0] sm:$0x1] %vm3_vm0, %v2_v6   ;;  %v109_v7 = vld [vmem:[%s209_s0 + $0x9] sm:$0x1]   ;;  %v110_v8 = vld [vmem:[%s209_s0 + $0x8] sm:$0x1]  }
   0x5   :  { %s139_s30 = smov 72   ;;  %s140_s2 = smov 64   ;;  %v111_v9 = vld [vmem:[%s209_s0 + $0x7] sm:$0x1]   ;;  %v112_v10 = vld [vmem:[%s209_s0 + $0x6] sm:$0x1]  }
   0x6   :  { %13 = vrot.lane.b32.xlu0 %v104_v2, %s135_s16  ;;  %25 = vrot.lane.b32.xlu1 %v106_v3, %s136_s17  ;;  %s141_s7 = smov 56   ;;  %s142_s8 = smov 48   ;;  %v113_v11 = vld [vmem:[%s209_s0 + $0x5] sm:$0x1]   ;;  %v114_v12 = vld [vmem:[%s209_s0 + $0x4] sm:$0x1]  }
   0x7   :  { %s143_s13 = smov 40   ;;  %s144_s14 = smov 32   ;;  %v115_v13 = vld [vmem:[%s209_s0 + $0x3] sm:$0x1]   ;;  %v116_v14 = vld [vmem:[%s209_s0 + $0x2] sm:$0x1]  }
   0x8   :  { %s145_s19 = smov 24   ;;  %s146_s20 = smov 16   ;;  %v117_v15 = vld [vmem:[%s209_s0 + $0x1] sm:$0x1]   ;;  %vm27_vm4 = vcmask 851712   ;;  %vm33_vm5 = vcmask 786112  }
   0x9   :  { %s147_s0 = smov 8   ;;  %vm39_vm6 = vcmask 720512   ;;  %vm45_vm7 = vcmask 654912   ;;  %vm51_vm8 = vcmask 589312   ;;  %vm57_vm9 = vcmask 523712  }
   0xa   :  { %31 = vrot.lane.b32.xlu0 %v107_v4, %s137_s24  ;;  %37 = vrot.lane.b32.xlu1 %v108_v5, %s138_s25  ;;  %vm63_vm10 = vcmask 458112   ;;  %vm69_vm11 = vcmask 392512   ;;  %vm75_vm12 = vcmask 326912   ;;  %vm81_vm13 = vcmask 261312  }
   0xb   :  { %vm87_vm14 = vcmask 195712   ;;  %vm93_vm15 = vcmask 130112  }
   0xe   :  { %43 = vrot.lane.b32.xlu0 %v109_v7, %s139_s30  ;;  %49 = vrot.lane.b32.xlu1 %v110_v8, %s140_s2 }
  0x12   :  { %55 = vrot.lane.b32.xlu0 %v111_v9, %s141_s7  ;;  %61 = vrot.lane.b32.xlu1 %v112_v10, %s142_s8 }
  0x16   :  { %67 = vrot.lane.b32.xlu0 %v113_v11, %s143_s13  ;;  %73 = vrot.lane.b32.xlu1 %v114_v12, %s144_s14 }
  0x1a   :  { %79 = vrot.lane.b32.xlu0 %v115_v13, %s145_s19  ;;  %85 = vrot.lane.b32.xlu1 %v116_v14, %s146_s20 }
  0x1e   :  { %91 = vrot.lane.b32.xlu0 %v117_v15, %s147_s0 }
  0x74   :  { %v8_v16 = vpop.permute.xlu0 %7   ;;  %v20_v17 = vpop.permute.xlu1 %19  }
  0x75   :  { %10 = vst.msk [vmem:[#allocation0] sm:$0x1] %vm9_vm1, %v8_v16  }
  0x78   :  { %v14_v18 = vpop.permute.xlu0 %13   ;;  %v26_v19 = vpop.permute.xlu1 %25  }
  0x79   :  { %16 = vst.msk [vmem:[#allocation0] sm:$0x1] %vm15_vm2, %v14_v18  }
  0x7a   :  { %22 = vst.msk [vmem:[#allocation0] sm:$0x1] %vm21_vm3, %v20_v17  }
  0x7b   :  { %28 = vst.msk [vmem:[#allocation0] sm:$0x1] %vm27_vm4, %v26_v19  }
  0x7c   :  { %v32_v20 = vpop.permute.xlu0 %31   ;;  %v38_v21 = vpop.permute.xlu1 %37  }
  0x7d   :  { %34 = vst.msk [vmem:[#allocation0] sm:$0x1] %vm33_vm5, %v32_v20  }
  0x7e   :  { %40 = vst.msk [vmem:[#allocation0] sm:$0x1] %vm39_vm6, %v38_v21  }
  0x80   :  { %v44_v22 = vpop.permute.xlu0 %43   ;;  %v50_v23 = vpop.permute.xlu1 %49  }
  0x81   :  { %46 = vst.msk [vmem:[#allocation0] sm:$0x1] %vm45_vm7, %v44_v22  }
  0x82   :  { %52 = vst.msk [vmem:[#allocation0] sm:$0x1] %vm51_vm8, %v50_v23  }
  0x84   :  { %v56_v24 = vpop.permute.xlu0 %55   ;;  %v62_v25 = vpop.permute.xlu1 %61  }
  0x85   :  { %58 = vst.msk [vmem:[#allocation0] sm:$0x1] %vm57_vm9, %v56_v24  }
  0x86   :  { %64 = vst.msk [vmem:[#allocation0] sm:$0x1] %vm63_vm10, %v62_v25  }
  0x88   :  { %v68_v26 = vpop.permute.xlu0 %67   ;;  %v74_v27 = vpop.permute.xlu1 %73  }
  0x89   :  { %70 = vst.msk [vmem:[#allocation0] sm:$0x1] %vm69_vm11, %v68_v26  }
  0x8a   :  { %76 = vst.msk [vmem:[#allocation0] sm:$0x1] %vm75_vm12, %v74_v27  }
  0x8c   :  { %v80_v28 = vpop.permute.xlu0 %79   ;;  %v86_v29 = vpop.permute.xlu1 %85  }
  0x8d   :  { %82 = vst.msk [vmem:[#allocation0] sm:$0x1] %vm81_vm13, %v80_v28  }
  0x8e   :  { %88 = vst.msk [vmem:[#allocation0] sm:$0x1] %vm87_vm14, %v86_v29  }
  0x90   :  { %v92_v30 = vpop.permute.xlu0 %91  }
  0x91   :  { %94 = vst.msk [vmem:[#allocation0] sm:$0x1] %vm93_vm15, %v92_v30  }
  0x98   :  { %v99_v31 = vld [vmem:[#allocation0] sm:$0x1] }
  0x99   :  { %102 = vst [vmem:[%s210_s1] sm:$0x1] %v99_v31 }

// kernel: conv_pool2d.1
= control target key start
LH: loop header
LB: loop body
LE: loop exit
PB: predicated region body
PF: predicated region fallthrough
CT: control target
= control target key end

     0   :  { %vm316_vm0 = vcmask 916480   ;;  %vm323_vm1 = vcmask 1046528   ;;  %vm331_vm2 = vcmask 1045504   ;;  %s710_s1 = inlined_call_operand.vmem [shape: f32[384,128], index: 1, kind: input, shape index: {}]   ;;  %s711_s0 = inlined_call_operand.vmem [shape: f32[2,18,128], index: 0, kind: input, shape index: {}]   ;;  %s712_s2 = inlined_call_operand.vmem [shape: f32[1,128], index: 2, kind: input, shape index: {}]   ;;  %s713_s3 = inlined_call_operand.vmem [shape: f32[2,14,128], index: 3, kind: output, shape index: {}]  }
   0x1   :  { %v82_v0 = vld [vmem:[%s710_s1 + $0xf8] sm:$0xff]  ;;  %v81_v2 = vld [vmem:[%s710_s1 + $0xf0] sm:$0xff]  ;;  %v80_v5 = vld [vmem:[%s710_s1 + $0xe8] sm:$0xff] }
   0x2   :  { %v66_v1 = vld [vmem:[%s710_s1 + $0x78] sm:$0xff]  ;;  %373 = vmatprep.subr.mxu0 %v82_v0  ;;  %v65_v3 = vld [vmem:[%s710_s1 + $0x70] sm:$0xff]  ;;  %v64_v7 = vld [vmem:[%s710_s1 + $0x68] sm:$0xff] }
   0x3   :  { %v98_v4 = vld [vmem:[%s710_s1 + $0x178] sm:$0xff]  ;;  %374 = vmatpush3.msra.mxu0 %v66_v1  ;;  %v97_v6 = vld [vmem:[%s710_s1 + $0x170] sm:$0xff]  ;;  %v96_v8 = vld [vmem:[%s710_s1 + $0x168] sm:$0xff] }
   0x4   :  { %437 = vmatprep.subr.mxu1 %v98_v4  ;;  %375 = vmatprep.subr.mxu0 %v81_v2  ;;  %v79_v9 = vld [vmem:[%s710_s1 + $0xe0] sm:$0xff]  ;;  %v78_v12 = vld [vmem:[%s710_s1 + $0xd8] sm:$0xff]  ;;  %v77_v15 = vld [vmem:[%s710_s1 + $0xd0] sm:$0xff] }
   0x5   :  { %438 = vmatpush3.msra.mxu1 %v98_v4  ;;  %376 = vmatpush3.msra.mxu0 %v65_v3  ;;  %v63_v10 = vld [vmem:[%s710_s1 + $0x60] sm:$0xff]  ;;  %v62_v13 = vld [vmem:[%s710_s1 + $0x58] sm:$0xff]  ;;  %v61_v16 = vld [vmem:[%s710_s1 + $0x50] sm:$0xff] }
   0x6   :  { %439 = vmatprep.subr.mxu1 %v97_v6  ;;  %377 = vmatprep.subr.mxu0 %v80_v5  ;;  %v95_v11 = vld [vmem:[%s710_s1 + $0x160] sm:$0xff]  ;;  %v94_v14 = vld [vmem:[%s710_s1 + $0x158] sm:$0xff]  ;;  %v93_v17 = vld [vmem:[%s710_s1 + $0x150] sm:$0xff] }
   0x7   :  { %440 = vmatpush3.msra.mxu1 %v97_v6  ;;  %378 = vmatpush3.msra.mxu0 %v64_v7  ;;  %v76_v18 = vld [vmem:[%s710_s1 + $0xc8] sm:$0xff]  ;;  %v75_v21 = vld [vmem:[%s710_s1 + $0xc0] sm:$0xff]  ;;  %v74_v24 = vld [vmem:[%s710_s1 + $0xb8] sm:$0xff] }
   0x8   :  { %441 = vmatprep.subr.mxu1 %v96_v8  ;;  %379 = vmatprep.subr.mxu0 %v79_v9  ;;  %v60_v19 = vld [vmem:[%s710_s1 + $0x48] sm:$0xff]  ;;  %v59_v22 = vld [vmem:[%s710_s1 + $0x40] sm:$0xff]  ;;  %v58_v25 = vld [vmem:[%s710_s1 + $0x38] sm:$0xff] }
   0x9   :  { %442 = vmatpush3.msra.mxu1 %v96_v8  ;;  %380 = vmatpush3.msra.mxu0 %v63_v10  ;;  %v92_v20 = vld [vmem:[%s710_s1 + $0x148] sm:$0xff]  ;;  %v91_v23 = vld [vmem:[%s710_s1 + $0x140] sm:$0xff]  ;;  %v90_v26 = vld [vmem:[%s710_s1 + $0x138] sm:$0xff] }
   0xa   :  { %443 = vmatprep.subr.mxu1 %v95_v11  ;;  %381 = vmatprep.subr.mxu0 %v78_v12  ;;  %v73_v27 = vld [vmem:[%s710_s1 + $0xb0] sm:$0xff]  ;;  %v72_v30 = vld [vmem:[%s710_s1 + $0xa8] sm:$0xff]  ;;  %v71_v33 = vld [vmem:[%s710_s1 + $0xa0] sm:$0xff] }
   0xb   :  { %444 = vmatpush3.msra.mxu1 %v95_v11  ;;  %382 = vmatpush3.msra.mxu0 %v62_v13  ;;  %v57_v28 = vld [vmem:[%s710_s1 + $0x30] sm:$0xff]  ;;  %v56_v31 = vld [vmem:[%s710_s1 + $0x28] sm:$0xff]  ;;  %v55_v34 = vld [vmem:[%s710_s1 + $0x20] sm:$0xff] }
   0xc   :  { %445 = vmatprep.subr.mxu1 %v94_v14  ;;  %383 = vmatprep.subr.mxu0 %v77_v15  ;;  %v89_v29 = vld [vmem:[%s710_s1 + $0x130] sm:$0xff]  ;;  %v88_v32 = vld [vmem:[%s710_s1 + $0x128] sm:$0xff]  ;;  %v87_v35 = vld [vmem:[%s710_s1 + $0x120] sm:$0xff] }
   0xd   :  { %446 = vmatpush3.msra.mxu1 %v94_v14  ;;  %384 = vmatpush3.msra.mxu0 %v61_v16  ;;  %v70_v36 = vld [vmem:[%s710_s1 + $0x98] sm:$0xff]  ;;  %v69_v39 = vld [vmem:[%s710_s1 + $0x90] sm:$0xff]  ;;  %v68_v42 = vld [vmem:[%s710_s1 + $0x88] sm:$0xff] }
   0xe   :  { %447 = vmatprep.subr.mxu1 %v93_v17  ;;  %385 = vmatprep.subr.mxu0 %v76_v18  ;;  %v54_v37 = vld [vmem:[%s710_s1 + $0x18] sm:$0xff]  ;;  %v53_v40 = vld [vmem:[%s710_s1 + $0x10] sm:$0xff]  ;;  %v18_v43 = vld [vmem:[%s711_s0 + $0x1] sm:$0xff] }
   0xf   :  { %448 = vmatpush3.msra.mxu1 %v93_v17  ;;  %386 = vmatpush3.msra.mxu0 %v60_v19  ;;  %v86_v38 = vld [vmem:[%s710_s1 + $0x118] sm:$0xff]  ;;  %v85_v41 = vld [vmem:[%s710_s1 + $0x110] sm:$0xff]  ;;  %v52_v44 = vld [vmem:[%s710_s1 + $0x8] sm:$0xff] }
  0x10   :  { %449 = vmatprep.subr.mxu1 %v92_v20  ;;  %387 = vmatprep.subr.mxu0 %v75_v21  ;;  %v67_v45 = vld [vmem:[%s710_s1 + $0x80] sm:$0xff]  ;;  %v84_v46 = vld [vmem:[%s710_s1 + $0x108] sm:$0xff]  ;;  %v364_v57 = vld [vmem:[%s711_s0 + $0x18] sm:$0xff] }
  0x11   :  { %450 = vmatpush3.msra.mxu1 %v92_v20  ;;  %388 = vmatpush3.msra.mxu0 %v59_v22  ;;  %v51_v47 = vld [vmem:[%s710_s1] sm:$0xff]  ;;  %v19_v50 = vld [vmem:[%s711_s0 + $0x9] sm:$0xff] }
  0x12   :  { %451 = vmatprep.subr.mxu1 %v91_v23  ;;  %389 = vmatprep.subr.mxu0 %v74_v24  ;;  %v14_v48 = vld [vmem:[%s711_s0] sm:$0xff]  ;;  %v23_v52 = vld [vmem:[%s711_s0 + $0xa] sm:$0xff] }
  0x13   :  { %452 = vmatpush3.msra.mxu1 %v91_v23  ;;  %390 = vmatpush3.msra.mxu0 %v58_v25  ;;  %v83_v49 = vld [vmem:[%s710_s1 + $0x100] sm:$0xff]  ;;  %v15_v53 = vld [vmem:[%s711_s0 + $0x8] sm:$0xff] }
  0x14   :  { %453 = vmatprep.subr.mxu1 %v90_v26  ;;  %391 = vmatprep.subr.mxu0 %v73_v27  ;;  %v22_v51 = vld [vmem:[%s711_s0 + $0x2] sm:$0xff]  ;;  %v368_v54 = vld [vmem:[%s711_s0 + $0x1a] sm:$0xff] }
  0x15   :  { %454 = vmatpush3.msra.mxu1 %v90_v26  ;;  %392 = vmatpush3.msra.mxu0 %v57_v28  ;;  %v366_v55 = vld [vmem:[%s711_s0 + $0x19] sm:$0xff]  ;;  %v369_v56 = vld [vmem:[%s711_s0 + $0x22] sm:$0xff] }
  0x16   :  { %455 = vmatprep.subr.mxu1 %v89_v29  ;;  %393 = vmatprep.subr.mxu0 %v72_v30  ;;  %v367_v58 = vld [vmem:[%s711_s0 + $0x21] sm:$0xff]  ;;  %v370_v62 = vld [vmem:[%s712_s2] ss:$0 sm:$0xff]  ;;  %s486_s2 = smov 112  }
  0x17   :  { %456 = vmatpush3.msra.mxu1 %v89_v29  ;;  %394 = vmatpush3.msra.mxu0 %v56_v31  ;;  %v365_v59 = vld [vmem:[%s711_s0 + $0x20] sm:$0xff]  ;;  %s485_s0 = smov 120  }
  0x18   :  { %457 = vmatprep.subr.mxu1 %v88_v32  ;;  %395 = vmatprep.subr.mxu0 %v71_v33 }
  0x19   :  { %458 = vmatpush3.msra.mxu1 %v88_v32  ;;  %396 = vmatpush3.msra.mxu0 %v55_v34 }
  0x1a   :  { %459 = vmatprep.subr.mxu1 %v87_v35  ;;  %397 = vmatprep.subr.mxu0 %v70_v36 }
  0x1b   :  { %460 = vmatpush3.msra.mxu1 %v87_v35  ;;  %398 = vmatpush3.msra.mxu0 %v54_v37 }
  0x1c   :  { %461 = vmatprep.subr.mxu1 %v86_v38  ;;  %399 = vmatprep.subr.mxu0 %v69_v39 }
  0x1d   :  { %462 = vmatpush3.msra.mxu1 %v86_v38  ;;  %400 = vmatpush3.msra.mxu0 %v53_v40 }
  0x1e   :  { %463 = vmatprep.subr.mxu1 %v85_v41  ;;  %401 = vmatprep.subr.mxu0 %v68_v42 }
  0x1f   :  { %170 = vmatprep.mubr.f32.mxu0 %v18_v43  ;;  %402 = vmatpush3.msra.mxu0 %v52_v44 }
  0x20   :  { %464 = vmatpush3.msra.mxu1 %v85_v41  ;;  %403 = vmatprep.subr.mxu0 %v67_v45 }
  0x21   :  { %465 = vmatprep.subr.mxu1 %v84_v46  ;;  %404 = vmatpush3.msra.mxu0 %v51_v47 }
  0x22   :  { %466 = vmatpush3.msra.mxu1 %v84_v46  ;;  %171 = vmatmul.mubr.f32.vlgmr.msra.gmra.mxu0 %v14_v48 }
  0x23   :  { %467 = vmatprep.subr.mxu1 %v83_v49  ;;  %175 = vmatprep.mubr.f32.mxu0 %v19_v50 }
  0x24   :  { %468 = vmatpush3.msra.mxu1 %v83_v49  ;;  %469 = vmatprep.mubr.f32.mxu1 %v22_v51 }
  0x25   :  { %470 = vmatmul.mubr.f32.vlgmr.msra.gmra.mxu1 %v23_v52 }
  0x26   :  { %176 = vmatmul.mubr.f32.gmra.mxu0 %v15_v53  ;;  %472 = vmatprep.mubr.f32.mxu1 %v368_v54 }
  0x27   :  { %180 = vmatprep.mubr.f32.mxu0 %v366_v55 }
  0x29   :  { %473 = vmatmul.mubr.f32.gmra.mxu1 %v369_v56 }
  0x2a   :  { %181 = vmatmul.mubr.f32.gmra.mxu0 %v364_v57 }
  0x2b   :  { %185 = vmatprep.mubr.f32.mxu0 %v367_v58 }
  0x2e   :  { %186 = vmatmul.mubr.f32.gmra.mxu0 %v365_v59 }
  0xe2   :  { %v405_v60 = vpop.f32.mrf.mxu0 }
  0xe4   :  { %v406_v61 = vpop.f32.mrf.mxu0 }
  0xe5   :  { %v407_v63 = vadd.f32 %v406_v61, %v405_v60  ;;  %v471_v0 = vpop.f32.mrf.mxu1 }
  0xe6   :  { %v408_v1 = vpop.f32.mrf.mxu0 }
  0xe7   :  { %v173_v2 = vadd.f32 %v407_v63, %v370_v62  ;;  %v257_v3 = vpop.f32.mrf.mxu1 }
  0xe8   :  { %v409_v4 = vpop.f32.mrf.mxu0 }
  0xe9   :  { %v410_v5 = vadd.f32 %v409_v4, %v408_v1  ;;  %v258_v6 = vadd.f32 %v257_v3, %v173_v2  ;;  %v474_v10 = vpop.f32.mrf.mxu1 }
  0xea   :  { %v411_v7 = vpop.f32.mrf.mxu0 }
  0xeb   :  { %v178_v8 = vadd.f32 %v410_v5, %v370_v62  ;;  %477 = vtanh.f32 %v258_v6  ;;  %v267_v15 = vpop.f32.mrf.mxu1 }
  0xec   :  { %v412_v9 = vpop.f32.mrf.mxu0 }
  0xed   :  { %v263_v11 = vadd.f32 %v471_v0, %v178_v8  ;;  %v413_v12 = vadd.f32 %v412_v9, %v411_v7 }
  0xee   :  { %v414_v13 = vpop.f32.mrf.mxu0 }
  0xef   :  { %479 = vtanh.f32 %v263_v11  ;;  %v183_v14 = vadd.f32 %v413_v12, %v370_v62 }
  0xf0   :  { %v415_v16 = vpop.f32.mrf.mxu0 }
  0xf1   :  { %v268_v17 = vadd.f32 %v267_v15, %v183_v14  ;;  %v416_v18 = vadd.f32 %v415_v16, %v414_v13 }
  0xf3   :  { %481 = vtanh.f32 %v268_v17  ;;  %v188_v19 = vadd.f32 %v416_v18, %v370_v62 }
  0xf5   :  { %v273_v20 = vadd.f32 %v474_v10, %v188_v19 }
  0xf7   :  { %483 = vtanh.f32 %v273_v20 }
  0xf8   :  { %v478_v21 = vpop.eup %477 }
  0xf9   :  { %284 = vrot.lane.b32.xlu0 %v478_v21, %s485_s0 }
  0xfc   :  { %v480_v22 = vpop.eup %479 }
  0xfd   :  { %302 = vrot.lane.b32.xlu1 %v480_v22, %s486_s2  ;;  %300 = vrot.lane.b32.xlu0 %v478_v21, %s486_s2 }
 0x100   :  { %v482_v23 = vpop.eup %481 }
 0x101   :  { %288 = vrot.lane.b32.xlu1 %v482_v23, %s485_s0  ;;  %286 = vrot.lane.b32.xlu0 %v480_v22, %s485_s0 }
 0x104   :  { %v484_v24 = vpop.eup %483 }
 0x105   :  { %290 = vrot.lane.b32.xlu1 %v484_v24, %s485_s0  ;;  %304 = vrot.lane.b32.xlu0 %v482_v23, %s486_s2 }
 0x109   :  { %306 = vrot.lane.b32.xlu1 %v484_v24, %s486_s2 }
 0x16b   :  { %v285_v25 = vpop.permute.xlu0 %284 }
 0x16c   :  { %v296_v28 = vmax.f32 %v478_v21, %v285_v25 }
 0x16f   :  { %v303_v26 = vpop.permute.xlu1 %302  ;;  %v301_v27 = vpop.permute.xlu0 %300 }
 0x170   :  { %v312_v29 = vmax.f32 %v296_v28, %v301_v27 }
 0x172   :  { %v317_v33 = vsel %vm316_vm0, %v312_v29, 0.0 }
 0x173   :  { %v289_v30 = vpop.permute.xlu1 %288  ;;  %v287_v31 = vpop.permute.xlu0 %286  ;;  %v324_v40 = vrot.slane %v317_v33, 1  ;;  %v332_v44 = vrot.slane %v317_v33, 2 }
 0x174   :  { %v297_v32 = vmax.f32 %v480_v22, %v287_v31  ;;  %v298_v34 = vmax.f32 %v482_v23, %v289_v30 }
 0x176   :  { %v313_v35 = vmax.f32 %v297_v32, %v303_v26 }
 0x177   :  { %v291_v36 = vpop.permute.xlu1 %290  ;;  %v305_v37 = vpop.permute.xlu0 %304 }
 0x178   :  { %v318_v38 = vsel %vm316_vm0, %v313_v35, 0.0  ;;  %v314_v39 = vmax.f32 %v298_v34, %v305_v37  ;;  %v299_v43 = vmax.f32 %v484_v24, %v291_v36 }
 0x179   :  { %v325_v41 = vrot.slane %v318_v38, 1  ;;  %v333_v42 = vrot.slane %v318_v38, 2 }
 0x17a   :  { %v319_v49 = vsel %vm316_vm0, %v314_v39, 0.0 }
 0x17b   :  { %v326_v45 = vsel %vm323_vm1, %v324_v40, %v325_v41  ;;  %v330_v46 = vmax.f32 %v318_v38, %v325_v41  ;;  %v307_v47 = vpop.permute.xlu1 %306  ;;  %v334_v51 = vsel %vm331_vm2, %v332_v44, %v333_v42  ;;  %v343_v55 = vrot.slane %v319_v49, 1 }
 0x17c   :  { %v329_v48 = vmax.f32 %v317_v33, %v326_v45  ;;  %v315_v50 = vmax.f32 %v299_v43, %v307_v47  ;;  %v350_v58 = vrot.slane %v319_v49, 2 }
 0x17d   :  { %v338_v52 = vmax.f32 %v330_v46, %v333_v42 }
 0x17e   :  { %v337_v53 = vmax.f32 %v329_v48, %v334_v51  ;;  %v320_v54 = vsel %vm316_vm0, %v315_v50, 0.0 }
 0x17f   :  { %340 = vst [vmem:[%s713_s3 + $0x8] sm:$0x3f] %v338_v52  ;;  %v344_v56 = vrot.slane %v320_v54, 1  ;;  %v351_v57 = vrot.slane %v320_v54, 2 }
 0x180   :  { %339 = vst [vmem:[%s713_s3] sm:$0xff] %v337_v53 }
 0x181   :  { %v345_v59 = vsel %vm323_vm1, %v343_v55, %v344_v56  ;;  %v349_v60 = vmax.f32 %v320_v54, %v344_v56  ;;  %v352_v62 = vsel %vm331_vm2, %v350_v58, %v351_v57 }
 0x182   :  { %v348_v61 = vmax.f32 %v319_v49, %v345_v59 }
 0x183   :  { %v356_v63 = vmax.f32 %v349_v60, %v351_v57 }
 0x184   :  { %v355_v0 = vmax.f32 %v348_v61, %v352_v62 }
 0x185   :  { %372 = vst [vmem:[%s713_s3 + $0x18] sm:$0x3f] %v356_v63 }
 0x186   :  { %371 = vst [vmem:[%s713_s3 + $0x10] sm:$0xff] %v355_v0 }

</bundles_post_ra>
